<compile_context>
chip_gen: v6e
topology: v6e:2x2x1
jax: 0.10.0
libtpu: 0.0.40
codegen_flags: <defaults>
</compile_context>

<pallas_src>
import functools

import jax
import jax.numpy as jnp
from jax.experimental import pallas as pl
from jax.experimental.pallas import tpu as pltpu

NHEADS = 3      # logp, qed, sas
HEAD_PAD = 8    # fused-head rows padded 3 -> 8 for an unmasked output store


def predictor_kernel(x_ref, w1_ref, b1_ref, w2_ref, b2_ref, wh_ref, bh_ref,
                     out_ref):
    # Activations are (features, batch_tile): lanes carry the batch.
    # dense[0:2]: Linear(L, L) + ReLU   (Dropout -> identity in eval)
    h1 = jnp.dot(w1_ref[...], x_ref[...], preferred_element_type=jnp.float32)
    h1 = jnp.maximum(h1 + b1_ref[...], 0.0)

    # dense[3:5]: Linear(L, hidden) + ReLU   (Dropout -> identity in eval)
    h2 = jnp.dot(w2_ref[...], h1.astype(w2_ref.dtype),
                 preferred_element_type=jnp.float32)
    h2 = jnp.maximum(h2 + b2_ref[...], 0.0)

    # fused heads [logp | qed | sas] (padded to 8 rows): Linear(hidden, 3)
    out = jnp.dot(wh_ref[...], h2.astype(wh_ref.dtype),
                  preferred_element_type=jnp.float32)
    out_ref[...] = out + bh_ref[...]


@functools.partial(jax.jit, static_argnames=("tb",))
def predictor_forward(x, params, *, tb=512):
    """x: (B, L) float32. Returns (logp, qed, sas), each (B, 1) float32."""
    w1, b1, w2, b2, wh, bh = params
    B, L = x.shape
    H = w2.shape[0]

    # bf16 matmul operands (f32 accumulation inside the kernel).
    w1b = w1.astype(jnp.bfloat16)                         # (L, L)
    w2b = w2.astype(jnp.bfloat16)                         # (H, L)
    whb = jnp.pad(wh.astype(jnp.bfloat16),
                  ((0, HEAD_PAD - NHEADS), (0, 0)))       # (8, H)
    bhp = jnp.pad(bh, ((0, HEAD_PAD - NHEADS), (0, 0)))   # (8, 1)

    # Batch on lanes: (L, B), padded to a lane-aligned multiple of the tile.
    x_t = x.T.astype(jnp.bfloat16)
    b_pad = ((B + 127) // 128) * 128
    tb = min(tb, b_pad)
    b_pad = ((b_pad + tb - 1) // tb) * tb
    if b_pad != B:
        x_t = jnp.pad(x_t, ((0, 0), (0, b_pad - B)))

    grid = (b_pad // tb,)
    flops = 2 * b_pad * (L * L + L * H + H * HEAD_PAD)
    bytes_accessed = int(
        x_t.size * 2                                      # bf16 activations in
        + (w1b.size + w2b.size + whb.size) * 2            # bf16 weights
        + (b1.size + b2.size + bhp.size) * 4              # f32 biases
        + HEAD_PAD * b_pad * 4)                           # f32 output

    out = pl.pallas_call(
        predictor_kernel,
        out_shape=jax.ShapeDtypeStruct((HEAD_PAD, b_pad), jnp.float32),
        grid_spec=pltpu.PrefetchScalarGridSpec(
            num_scalar_prefetch=0,
            grid=grid,
            in_specs=[
                pl.BlockSpec((L, tb), lambda i: (0, i)),        # x  (L, B)
                pl.BlockSpec((L, L), lambda i: (0, 0)),         # w1 (resident)
                pl.BlockSpec((L, 1), lambda i: (0, 0)),         # b1
                pl.BlockSpec((H, L), lambda i: (0, 0)),         # w2
                pl.BlockSpec((H, 1), lambda i: (0, 0)),         # b2
                pl.BlockSpec((HEAD_PAD, H), lambda i: (0, 0)),  # wh
                pl.BlockSpec((HEAD_PAD, 1), lambda i: (0, 0)),  # bh
            ],
            out_specs=pl.BlockSpec((HEAD_PAD, tb), lambda i: (0, i)),
        ),
        compiler_params=pltpu.CompilerParams(
            dimension_semantics=("parallel",)),
        cost_estimate=pl.CostEstimate(
            flops=flops, transcendentals=0, bytes_accessed=bytes_accessed),
    )(x_t, w1b, b1, w2b, b2, whb, bhp)

    res = out[:NHEADS, :B].T           # (B, 3)
    logp = res[:, 0:1]
    qed = res[:, 1:2]
    sas = res[:, 2:3]
    return logp, qed, sas


def init_params(key, L, hidden_size):
    """Deterministic synthetic parameters (PyTorch-Linear-like uniform init),
    stored in PyTorch layout: W (out_features, in_features), b (out, 1)."""
    ks = jax.random.split(key, 10)

    def lin(kw, kb, fan_in, fan_out):
        bound = 1.0 / jnp.sqrt(fan_in)
        w = jax.random.uniform(kw, (fan_out, fan_in), jnp.float32, -bound, bound)
        b = jax.random.uniform(kb, (fan_out, 1), jnp.float32, -bound, bound)
        return w, b

    w1, b1 = lin(ks[0], ks[1], L, L)
    w2, b2 = lin(ks[2], ks[3], L, hidden_size)
    w_logp, b_logp = lin(ks[4], ks[5], hidden_size, 1)
    w_qed, b_qed = lin(ks[6], ks[7], hidden_size, 1)
    w_sas, b_sas = lin(ks[8], ks[9], hidden_size, 1)

    # Fuse the three heads: (3, hidden) / (3, 1)
    wh = jnp.concatenate([w_logp, w_qed, w_sas], axis=0)
    bh = jnp.concatenate([b_logp, b_qed, b_sas], axis=0)
    return (w1, b1, w2, b2, wh, bh)


if __name__ == "__main__":
    L = 32
    hidden_size = 48
    batch = 8

    key = jax.random.PRNGKey(0)
    k_x, k_p = jax.random.split(key)
    x = jax.random.normal(k_x, (batch, L), dtype=jnp.float32)
    params = init_params(k_p, L, hidden_size)

    logp, qed, sas = predictor_forward(x, params)
    jax.block_until_ready((logp, qed, sas))

    # Reference: eval-mode forward with the same bf16 operand rounding as the
    # kernel (f32 accumulation), so tolerances stay tight.
    w1, b1, w2, b2, wh, bh = params
    bf = lambda a: a.astype(jnp.bfloat16).astype(jnp.float32)
    h = jnp.maximum(bf(x) @ bf(w1).T + b1.T, 0.0)
    h = jnp.maximum(bf(h) @ bf(w2).T + b2.T, 0.0)
    ref = bf(h) @ bf(wh).T + bh.T      # (B, 3)

    got = jnp.concatenate([logp, qed, sas], axis=1)
    assert logp.shape == (batch, 1) and qed.shape == (batch, 1) and sas.shape == (batch, 1)
    err = float(jnp.max(jnp.abs(got - ref)))
    assert jnp.allclose(got, ref, atol=5e-3, rtol=5e-3), err

    print("KERNEL_OK")
</pallas_src>

<mosaic_0001>
module attributes {stable_mosaic.version = 11 : i64} {
  func.func @predictor_kernel(%arg0: i32, %arg1: memref<32x128xbf16, #tpu.memory_space<vmem>>, %arg2: memref<32x32xbf16, #tpu.memory_space<vmem>>, %arg3: memref<32x1xf32, #tpu.memory_space<vmem>>, %arg4: memref<48x32xbf16, #tpu.memory_space<vmem>>, %arg5: memref<48x1xf32, #tpu.memory_space<vmem>>, %arg6: memref<8x48xbf16, #tpu.memory_space<vmem>>, %arg7: memref<8x1xf32, #tpu.memory_space<vmem>>, %arg8: memref<8x128xf32, #tpu.memory_space<vmem>>) attributes {dimension_semantics = [#tpu.dimension_semantics<parallel>], iteration_bounds = array<i64: 1>, scalar_prefetch = 0 : i64, scratch_operands = 0 : i64, tpu.core_type = #tpu.core_type<tc>, window_params = [{transform_indices = @transform_0, window_bounds = array<i64: 32, 128>}, {pipeline_mode = #tpu.pipeline_mode<synchronous>, transform_indices = @transform_1, window_bounds = array<i64: 32, 32>}, {pipeline_mode = #tpu.pipeline_mode<synchronous>, transform_indices = @transform_2, window_bounds = array<i64: 32, 1>}, {pipeline_mode = #tpu.pipeline_mode<synchronous>, transform_indices = @transform_3, window_bounds = array<i64: 48, 32>}, {pipeline_mode = #tpu.pipeline_mode<synchronous>, transform_indices = @transform_4, window_bounds = array<i64: 48, 1>}, {pipeline_mode = #tpu.pipeline_mode<synchronous>, transform_indices = @transform_5, window_bounds = array<i64: 8, 48>}, {pipeline_mode = #tpu.pipeline_mode<synchronous>, transform_indices = @transform_6, window_bounds = array<i64: 8, 1>}, {transform_indices = @transform_7, window_bounds = array<i64: 8, 128>}]} {
    %c0 = arith.constant 0 : index
    %c0_0 = arith.constant 0 : index
    %0 = vector.load %arg2[%c0, %c0_0] : memref<32x32xbf16, #tpu.memory_space<vmem>>, vector<32x32xbf16>
    %c0_1 = arith.constant 0 : index
    %c0_2 = arith.constant 0 : index
    %1 = vector.load %arg1[%c0_1, %c0_2] : memref<32x128xbf16, #tpu.memory_space<vmem>>, vector<32x128xbf16>
    %cst = arith.constant dense<0.000000e+00> : vector<32x128xf32>
    %2 = tpu.matmul %0, %1, %cst {dimension_numbers = #tpu.dot_dimension_numbers<[1], [0], [0], [1], [0, 0, 1, 1], [], []>} : vector<32x32xbf16>, vector<32x128xbf16>, vector<32x128xf32> -> vector<32x128xf32>
    %c0_3 = arith.constant 0 : index
    %c0_4 = arith.constant 0 : index
    %3 = vector.load %arg3[%c0_3, %c0_4] : memref<32x1xf32, #tpu.memory_space<vmem>>, vector<32x1xf32>
    %4 = vector.broadcast %3 : vector<32x1xf32> to vector<32x128xf32>
    %5 = arith.addf %2, %4 : vector<32x128xf32>
    %cst_5 = arith.constant 0.000000e+00 : f32
    %6 = vector.broadcast %cst_5 : f32 to vector<32x128xf32>
    %7 = arith.maximumf %5, %6 : vector<32x128xf32>
    %c0_6 = arith.constant 0 : index
    %c0_7 = arith.constant 0 : index
    %8 = vector.load %arg4[%c0_6, %c0_7] : memref<48x32xbf16, #tpu.memory_space<vmem>>, vector<48x32xbf16>
    %9 = arith.truncf %7 : vector<32x128xf32> to vector<32x128xbf16>
    %cst_8 = arith.constant dense<0.000000e+00> : vector<48x128xf32>
    %10 = tpu.matmul %8, %9, %cst_8 {dimension_numbers = #tpu.dot_dimension_numbers<[1], [0], [0], [1], [0, 0, 1, 1], [], []>} : vector<48x32xbf16>, vector<32x128xbf16>, vector<48x128xf32> -> vector<48x128xf32>
    %c0_9 = arith.constant 0 : index
    %c0_10 = arith.constant 0 : index
    %11 = vector.load %arg5[%c0_9, %c0_10] : memref<48x1xf32, #tpu.memory_space<vmem>>, vector<48x1xf32>
    %12 = vector.broadcast %11 : vector<48x1xf32> to vector<48x128xf32>
    %13 = arith.addf %10, %12 : vector<48x128xf32>
    %cst_11 = arith.constant 0.000000e+00 : f32
    %14 = vector.broadcast %cst_11 : f32 to vector<48x128xf32>
    %15 = arith.maximumf %13, %14 : vector<48x128xf32>
    %c0_12 = arith.constant 0 : index
    %c0_13 = arith.constant 0 : index
    %16 = vector.load %arg6[%c0_12, %c0_13] : memref<8x48xbf16, #tpu.memory_space<vmem>>, vector<8x48xbf16>
    %17 = arith.truncf %15 : vector<48x128xf32> to vector<48x128xbf16>
    %cst_14 = arith.constant dense<0.000000e+00> : vector<8x128xf32>
    %18 = tpu.matmul %16, %17, %cst_14 {dimension_numbers = #tpu.dot_dimension_numbers<[1], [0], [0], [1], [0, 0, 1, 1], [], []>} : vector<8x48xbf16>, vector<48x128xbf16>, vector<8x128xf32> -> vector<8x128xf32>
    %c0_15 = arith.constant 0 : index
    %c0_16 = arith.constant 0 : index
    %19 = vector.load %arg7[%c0_15, %c0_16] : memref<8x1xf32, #tpu.memory_space<vmem>>, vector<8x1xf32>
    %20 = vector.broadcast %19 : vector<8x1xf32> to vector<8x128xf32>
    %21 = arith.addf %18, %20 : vector<8x128xf32>
    %c0_17 = arith.constant 0 : index
    %c0_18 = arith.constant 0 : index
    %22 = vector.load %arg8[%c0_17, %c0_18] : memref<8x128xf32, #tpu.memory_space<vmem>>, vector<8x128xf32>
    tpu.vector_store %arg8[%c0_17, %c0_18], %21 {strides = array<i32>} : memref<8x128xf32, #tpu.memory_space<vmem>>, vector<8x128xf32>,
    return
  }
  func.func @transform_0(%arg0: i32) -> (i32, i32) {
    %c0_i32 = arith.constant 0 : i32
    %c0_i32_0 = arith.constant 0 : i32
    return %c0_i32, %arg0 : i32, i32
  }
  func.func @transform_1(%arg0: i32) -> (i32, i32) {
    %c0_i32 = arith.constant 0 : i32
    %c0_i32_0 = arith.constant 0 : i32
    %c0_i32_1 = arith.constant 0 : i32
    return %c0_i32, %c0_i32_0 : i32, i32
  }
  func.func @transform_2(%arg0: i32) -> (i32, i32) {
    %c0_i32 = arith.constant 0 : i32
    %c0_i32_0 = arith.constant 0 : i32
    %c0_i32_1 = arith.constant 0 : i32
    return %c0_i32, %c0_i32_0 : i32, i32
  }
  func.func @transform_3(%arg0: i32) -> (i32, i32) {
    %c0_i32 = arith.constant 0 : i32
    %c0_i32_0 = arith.constant 0 : i32
    %c0_i32_1 = arith.constant 0 : i32
    return %c0_i32, %c0_i32_0 : i32, i32
  }
  func.func @transform_4(%arg0: i32) -> (i32, i32) {
    %c0_i32 = arith.constant 0 : i32
    %c0_i32_0 = arith.constant 0 : i32
    %c0_i32_1 = arith.constant 0 : i32
    return %c0_i32, %c0_i32_0 : i32, i32
  }
  func.func @transform_5(%arg0: i32) -> (i32, i32) {
    %c0_i32 = arith.constant 0 : i32
    %c0_i32_0 = arith.constant 0 : i32
    %c0_i32_1 = arith.constant 0 : i32
    return %c0_i32, %c0_i32_0 : i32, i32
  }
  func.func @transform_6(%arg0: i32) -> (i32, i32) {
    %c0_i32 = arith.constant 0 : i32
    %c0_i32_0 = arith.constant 0 : i32
    %c0_i32_1 = arith.constant 0 : i32
    return %c0_i32, %c0_i32_0 : i32, i32
  }
  func.func @transform_7(%arg0: i32) -> (i32, i32) {
    %c0_i32 = arith.constant 0 : i32
    %c0_i32_0 = arith.constant 0 : i32
    return %c0_i32, %arg0 : i32, i32
  }
}

</mosaic_0001>

<bundles_post_ra>
// kernel: predictor_forward.1
= control target key start
LH: loop header
LB: loop body
LE: loop exit
PB: predicated region body
PF: predicated region fallthrough
CT: control target
= control target key end

     0   :  { %v403_v1 = vmov 0   ;;  %vm81_vm0 = vcmask 261120   ;;  %v404_v16 = vmov 0.0   ;;  %vm405_vm1 = vmmov 0   ;;  %s524_s0 = inlined_call_operand.vmem [shape: bf16[32,128], index: 0, kind: input, shape index: {}]   ;;  %s525_s1 = inlined_call_operand.vmem [shape: bf16[32,32], index: 1, kind: input, shape index: {}]   ;;  %s526_s2 = inlined_call_operand.vmem [shape: f32[32,1], index: 2, kind: input, shape index: {}]   ;;  %s527_s4 = inlined_call_operand.vmem [shape: f32[48,1], index: 4, kind: input, shape index: {}]   ;;  %s528_s6 = inlined_call_operand.vmem [shape: f32[8,1], index: 6, kind: input, shape index: {}]   ;;  %s529_s3 = inlined_call_operand.vmem [shape: bf16[48,32], index: 3, kind: input, shape index: {}]   ;;  %s530_s5 = inlined_call_operand.vmem [shape: bf16[8,48], index: 5, kind: input, shape index: {}]   ;;  %s531_s7 = inlined_call_operand.vmem [shape: f32[8,128], index: 7, kind: output, shape index: {}]  }
   0x1   :  { %v396_v0 = vld [vmem:[%s524_s0 + $0x8] sm:$0xff]   ;;  %394 = vset.pattern.permute.xlu0 %v403_v1  ;;  %395 = vset.pattern.permute.xlu1 %v403_v1  ;;  %v397_v2 = vld [vmem:[%s524_s0] sm:$0xff]   ;;  %v37_v4 = vld [vmem:[%s526_s2 + $0x10] sm:$0xff]  ;;  %vm282_vm2 = vcmask 392192  }
   0x2   :  { %357 = vmatprep.subr.bf16.mxu0 %v396_v0  ;;  %v398_v3 = vld [vmem:[%s525_s1] sm:$0xff]   ;;  %51 = vperm.xlu0 %394, %v37_v4   ;;  %v399_v6 = vld [vmem:[%s525_s1 + $0x8] sm:$0xff]   ;;  %v38_v7 = vld [vmem:[%s526_s2 + $0x18] sm:$0xff] }
   0x3   :  { %358 = vmatpush3.bf16.msra.mxu0 %v396_v0  ;;  %361 = vmatprep.mubr.msk.bf16.mxu0 %vm81_vm0, %v398_v3  ;;  %v35_v5 = vld [vmem:[%s526_s2] sm:$0xff]  ;;  %v36_v8 = vld [vmem:[%s526_s2 + $0x8] sm:$0xff]  ;;  %v151_v11 = vld [vmem:[%s527_s4 + $0x10] sm:$0xff] }
   0x4   :  { %359 = vmatprep.subr.bf16.mxu0 %v397_v2  ;;  %41 = vperm.xlu1 %395, %v35_v5   ;;  %v153_v9 = vld [vmem:[%s527_s4 + $0x20] sm:$0xff]  ;;  %v154_v10 = vld [vmem:[%s527_s4 + $0x28] sm:$0xff]  ;;  %v152_v12 = vld [vmem:[%s527_s4 + $0x18] sm:$0xff] }
   0x5   :  { %v149_v13 = vld [vmem:[%s527_s4] sm:$0xff]  ;;  %v150_v14 = vld [vmem:[%s527_s4 + $0x8] sm:$0xff]  ;;  %365 = vmatprep.subr.bf16.mxu1 %v404_v16  ;;  %369 = vmatprep.mubr.msk.bf16.mxu1 %vm405_vm1, %v404_v16  ;;  %v402_v37 = vld [vmem:[%s529_s3 + $0x10] sm:$0xff]  }
   0x6   :  { %56 = vperm.xlu0 %394, %v38_v7   ;;  %v276_v15 = vld [vmem:[%s528_s6] sm:$0xff]  ;;  %v401_v36 = vld [vmem:[%s529_s3 + $0x8] sm:$0xff]  }
   0x7   :  { %360 = vmatpush3.bf16.msra.mxu0 %v397_v2  ;;  %v400_v35 = vld [vmem:[%s529_s3] sm:$0xff]  }
   0x8   :  { %46 = vperm.xlu1 %395, %v36_v8   ;;  %381 = vmatprep.subr.bf16.mxu0 %v404_v16  ;;  %v272_v7 = vld [vmem:[%s530_s5] sm:$0xf] }
   0xa   :  { %362 = vmatmul.mubr.msk.bf16.vlgmr.msra.gmra.mxu0 %vm81_vm0, %v399_v6  ;;  %177 = vperm.xlu0 %394, %v153_v9  }
   0xb   :  { %387 = vmatprep.mubr.msk.bf16.mxu0 %vm405_vm1, %v404_v16 }
   0xc   :  { %182 = vperm.xlu1 %395, %v154_v10  }
   0xe   :  { %167 = vperm.xlu0 %394, %v151_v11  }
  0x10   :  { %172 = vperm.xlu1 %395, %v152_v12  }
  0x12   :  { %157 = vperm.xlu0 %394, %v149_v13  }
  0x14   :  { %162 = vperm.xlu1 %395, %v150_v14  }
  0x16   :  { %279 = vperm.xlu0 %394, %v276_v15  }
  0x7d   :  { %v52_v17 = vpop.permute.xlu0 %51 }
  0x7f   :  { %v42_v18 = vpop.permute.xlu1 %41 }
  0x81   :  { %v57_v22 = vpop.permute.xlu0 %56 }
  0x83   :  { %v47_v25 = vpop.permute.xlu1 %46 }
  0x85   :  { %v178_v46 = vpop.permute.xlu0 %177 }
  0x87   :  { %v183_v44 = vpop.permute.xlu1 %182 }
  0x89   :  { %v168_v52 = vpop.permute.xlu0 %167 }
  0x8b   :  { %v173_v49 = vpop.permute.xlu1 %172 }
  0x8d   :  { %v158_v0 = vpop.permute.xlu0 %157 }
  0x8f   :  { %v163_v60 = vpop.permute.xlu1 %162 }
  0x91   :  { %v280_v8 = vpop.permute.xlu0 %279 }
  0xca   :  { %v363_v19 = vpop.f32.mrf.mxu0 }
  0xcb   :  { %v131_v21 = vadd.f32 %v363_v19, %v52_v17 }
  0xcc   :  { %v122_v20 = vpop.f32.mrf.mxu0 }
  0xcd   :  { %v139_v27 = vmax.f32 %v131_v21, 0.0  ;;  %v123_v28 = vadd.f32 %v122_v20, %v42_v18 }
  0xce   :  { %v364_v23 = vpop.f32.mrf.mxu0 }
  0xcf   :  { %v134_v24 = vadd.f32 %v364_v23, %v57_v22  ;;  %v137_v33 = vmax.f32 %v123_v28, 0.0 }
  0xd0   :  { %v125_v26 = vpop.f32.mrf.mxu0 }
  0xd1   :  { %v140_v29 = vmax.f32 %v134_v24, 0.0  ;;  %v126_v30 = vadd.f32 %v125_v26, %v47_v25 }
  0xd3   :  { %v138_v31 = vmax.f32 %v126_v30, 0.0  ;;  %v148_v32 = vpack.c.bf16 %v140_v29, %v139_v27 }
  0xd5   :  { %366 = vmatpush3.bf16.msra.mxu1 %v148_v32  ;;  %v147_v34 = vpack.c.bf16 %v138_v31, %v137_v33 }
  0xd6   :  { %367 = vmatprep.subr.bf16.mxu1 %v404_v16 }
  0xd9   :  { %368 = vmatpush3.bf16.msra.mxu1 %v147_v34 }
  0xdc   :  { %370 = vmatmul.mubr.msk.bf16.vlgmr.msra.gmra.mxu1 %vm81_vm0, %v400_v35 }
  0xdd   :  { %373 = vmatprep.mubr.msk.bf16.mxu1 %vm405_vm1, %v404_v16 }
  0xe4   :  { %374 = vmatmul.mubr.msk.bf16.gmra.mxu1 %vm81_vm0, %v401_v36 }
  0xe5   :  { %377 = vmatprep.mubr.msk.bf16.mxu1 %vm405_vm1, %v404_v16 }
  0xec   :  { %378 = vmatmul.mubr.msk.bf16.gmra.mxu1 %vm81_vm0, %v402_v37 }
 0x19c   :  { %v243_v38 = vpop.f32.mrf.mxu1 }
 0x19d   :  { %v244_v1 = vadd.f32 %v243_v38, %v158_v0 }
 0x19e   :  { %v371_v39 = vpop.f32.mrf.mxu1 }
 0x19f   :  { %v266_v5 = vmax.f32 %v244_v1, 0.0 }
 0x1a0   :  { %v246_v40 = vpop.f32.mrf.mxu1 }
 0x1a1   :  { %v247_v61 = vadd.f32 %v246_v40, %v163_v60 }
 0x1a2   :  { %v372_v41 = vpop.f32.mrf.mxu1 }
 0x1a3   :  { %v267_v3 = vmax.f32 %v247_v61, 0.0 }
 0x1a4   :  { %v251_v42 = vpop.f32.mrf.mxu1 }
 0x1a5   :  { %v252_v57 = vadd.f32 %v251_v42, %v168_v52  ;;  %v273_v6 = vpack.c.bf16 %v267_v3, %v266_v5 }
 0x1a6   :  { %v375_v43 = vpop.f32.mrf.mxu1 }
 0x1a7   :  { %v268_v2 = vmax.f32 %v252_v57, 0.0 }
 0x1a8   :  { %v254_v45 = vpop.f32.mrf.mxu1 }
 0x1a9   :  { %v255_v54 = vadd.f32 %v254_v45, %v173_v49 }
 0x1aa   :  { %v376_v47 = vpop.f32.mrf.mxu1 }
 0x1ab   :  { %v269_v62 = vmax.f32 %v255_v54, 0.0 }
 0x1ac   :  { %v259_v48 = vpop.f32.mrf.mxu1 }
 0x1ad   :  { %v260_v51 = vadd.f32 %v259_v48, %v178_v46  ;;  %v274_v4 = vpack.c.bf16 %v269_v62, %v268_v2 }
 0x1ae   :  { %v379_v50 = vpop.f32.mrf.mxu1 }
 0x1af   :  { %v270_v58 = vmax.f32 %v260_v51, 0.0 }
 0x1b0   :  { %v262_v53 = vpop.f32.mrf.mxu1 }
 0x1b1   :  { %v263_v55 = vadd.f32 %v262_v53, %v183_v44 }
 0x1b2   :  { %v380_v56 = vpop.f32.mrf.mxu1 }
 0x1b3   :  { %v271_v59 = vmax.f32 %v263_v55, 0.0 }
 0x1b5   :  { %v275_v63 = vpack.c.bf16 %v271_v59, %v270_v58 }
 0x1b7   :  { %382 = vmatpush3.bf16.msra.mxu0 %v275_v63 }
 0x1b8   :  { %383 = vmatprep.subr.bf16.mxu0 %v404_v16 }
 0x1bb   :  { %384 = vmatpush3.bf16.msra.mxu0 %v274_v4 }
 0x1bc   :  { %385 = vmatprep.subr.bf16.mxu0 %v404_v16 }
 0x1bf   :  { %386 = vmatpush3.bf16.msra.mxu0 %v273_v6 }
 0x1c2   :  { %388 = vmatmul.mubr.msk.bf16.vlgmr.msra.gmra.mxu0 %vm282_vm2, %v272_v7 }
 0x282   :  { %v320_v9 = vpop.f32.mrf.mxu0 }
 0x283   :  { %v321_v10 = vadd.f32 %v320_v9, %v280_v8 }
 0x284   :  { %v389_v11 = vpop.f32.mrf.mxu0 }
 0x285   :  { %326 = vst [vmem:[%s531_s7] sm:$0xff] %v321_v10 }
 0x286   :  { %v323_v12 = vpop.f32.mrf.mxu0 }
 0x288   :  { %v390_v13 = vpop.f32.mrf.mxu0 }

</bundles_post_ra>
